<compile_context>
chip_gen: v5e
topology: v5e:2x2
jax: 0.10.0
libtpu: 0.0.40
codegen_flags: <defaults>
</compile_context>

<pallas_src>
import jax
import jax.numpy as jnp
from jax.experimental import pallas as pl
from jax.experimental.pallas import tpu as pltpu


# Conservative double-buffered working-set budget: fits v7x's 64 MiB/TC VMEM
# with headroom; v5e/v6e (128 MiB) could go larger but this already reaches a
# tile size where the streamed-weight kernel sits near the HBM roofline.
_VMEM_BUDGET = 40 * 1024 * 1024
_VMEM_LIMIT = 48 * 1024 * 1024


def _pick_tiling(S, H, V):
    """Pick (n_cores, tv): vocab split across TensorCores and per-step vocab
    tile -- the largest lane-dense (multiple-of-128) tile fitting the budget."""
    for n_cores in (2, 1):                       # 2 -> both TCs on v7x; serial (still correct) on 1-TC chips
        for tv in (2048, 1024, 512, 256, 128):   # multiples of 128 -> unmasked lane-dense vst for logits
            if V % (n_cores * tv):
                continue
            need = (2 * H * tv * 2        # bf16 weight tile, double-buffered
                    + 2 * S * tv * 4      # f32 logits tile, double-buffered
                    + 2 * tv * 4          # f32 bias tile, double-buffered
                    + 2 * S * H * 2       # bf16 hidden (resident)
                    + S * 128 * 8         # lane-padded max/argmax scratch
                    + 4 * S * 4 * 2)      # tiny per-core partial outputs
            if need <= _VMEM_BUDGET:
                return n_cores, tv
    raise ValueError(f"no valid vocab tiling for V={V}, H={H}, S={S}")


# ---------------------------------------------------------------------------
# Pallas kernel: lm_head projection + online greedy argmax.
# Grid = (core_split, vocab_tiles_per_core); logits written tile-by-tile,
# running (max, argmax) carried in VMEM scratch, per-core partials emitted at
# the last vocab tile and merged (<=2-way) in the wrapper.
# ---------------------------------------------------------------------------
def _lm_head_sample_kernel(h_ref, w_ref, b_ref,
                           logits_ref, pmax_ref, parg_ref,
                           max_sc, idx_sc):
    c = pl.program_id(0)        # TensorCore split of the vocab ("parallel")
    j = pl.program_id(1)        # vocab tile within this core ("arbitrary")
    nj = pl.num_programs(1)

    @pl.when(j == 0)
    def _():
        max_sc[...] = jnp.full_like(max_sc, -jnp.inf)
        idx_sc[...] = jnp.zeros_like(idx_sc)

    # [S, H] bf16 @ [H, tv] bf16 on the MXU, f32 accumulation; weight was
    # pre-transposed once at init so there is no in-kernel transpose/relayout.
    logits = jnp.dot(h_ref[...], w_ref[...],
                     preferred_element_type=jnp.float32) + b_ref[...]
    logits_ref[...] = logits

    tv = logits.shape[-1]
    base = (c * nj + j) * tv
    local_max = jnp.max(logits, axis=-1, keepdims=True)
    # First-occurrence argmax via 2-D iota + masked min-reduce (XLU), matching
    # jnp.argmax tie-breaking without relying on lax.argmax lowering.
    lane = jax.lax.broadcasted_iota(jnp.int32, logits.shape, dimension=1)
    local_arg = jnp.min(jnp.where(logits == local_max, lane, tv),
                        axis=-1, keepdims=True).astype(jnp.int32) + base

    better = local_max > max_sc[...]          # strict '>' keeps first occurrence
    idx_sc[...] = jnp.where(better, local_arg, idx_sc[...])
    max_sc[...] = jnp.maximum(max_sc[...], local_max)

    @pl.when(j == nj - 1)
    def _():
        pmax_ref[0] = max_sc[...]
        parg_ref[0] = idx_sc[...]


def lm_head_sample(hidden, lm_head_weight_t_bf16, lm_head_bias):
    """logits = hidden @ W.T + b (f32); greedy tokens = argmax(logits, -1).

    `lm_head_weight_t_bf16` is the pre-transposed [H, V] bf16 lm_head weight.
    """
    S, H = hidden.shape
    H2, V = lm_head_weight_t_bf16.shape
    assert H == H2 and S % 8 == 0

    n_cores, tv = _pick_tiling(S, H, V)
    inner = V // (n_cores * tv)          # vocab tiles per core

    hidden_bf16 = hidden.astype(jnp.bfloat16)
    bias2d = lm_head_bias.reshape(1, V).astype(jnp.float32)

    cost = pl.CostEstimate(
        flops=2 * S * H * V,
        transcendentals=0,
        bytes_accessed=H * V * 2 + S * V * 4 + S * H * 2 + V * 4)

    logits, pmax, parg = pl.pallas_call(
        _lm_head_sample_kernel,
        out_shape=(jax.ShapeDtypeStruct((S, V), jnp.float32),
                   jax.ShapeDtypeStruct((n_cores, S, 1), jnp.float32),
                   jax.ShapeDtypeStruct((n_cores, S, 1), jnp.int32)),
        grid_spec=pltpu.PrefetchScalarGridSpec(
            num_scalar_prefetch=0,
            grid=(n_cores, inner),
            in_specs=[
                pl.BlockSpec((S, H), lambda c, j: (0, 0)),               # hidden (resident)
                pl.BlockSpec((H, tv), lambda c, j: (0, c * inner + j)),  # weight tile (streamed)
                pl.BlockSpec((1, tv), lambda c, j: (0, c * inner + j)),  # bias tile
            ],
            out_specs=[
                pl.BlockSpec((S, tv), lambda c, j: (0, c * inner + j)),  # logits tile
                pl.BlockSpec((1, S, 1), lambda c, j: (c, 0, 0)),         # per-core max
                pl.BlockSpec((1, S, 1), lambda c, j: (c, 0, 0)),         # per-core argmax
            ],
            scratch_shapes=[
                pltpu.VMEM((S, 1), jnp.float32),      # running max
                pltpu.VMEM((S, 1), jnp.int32),        # running argmax
            ],
        ),
        compiler_params=pltpu.CompilerParams(
            dimension_semantics=("parallel", "arbitrary"),
            vmem_limit_bytes=_VMEM_LIMIT),
        cost_estimate=cost,
    )(hidden_bf16, lm_head_weight_t_bf16, bias2d)

    # Merge the (<=2) per-core partials. Core 0 owns the lower vocab indices,
    # so ties must resolve to core 0 to match jnp.argmax (first occurrence).
    if n_cores == 1:
        tokens = parg[0, :, 0]
    else:
        tokens = jnp.where(pmax[1, :, 0] > pmax[0, :, 0],
                           parg[1, :, 0], parg[0, :, 0])
    return logits, tokens


# ---------------------------------------------------------------------------
# ORTBackend equivalent
# ---------------------------------------------------------------------------
class ORTBackendJAX:
    def __init__(self, vocab_size, hidden_size, max_position, key):
        k1, k2, k3, k4 = jax.random.split(key, 4)
        self.embed_tokens = jax.random.normal(
            k1, (vocab_size, hidden_size), jnp.float32) * 0.02
        self.embed_positions = jax.random.normal(
            k2, (max_position, hidden_size), jnp.float32) * 0.02
        self.lm_head_weight = jax.random.normal(
            k3, (vocab_size, hidden_size), jnp.float32) * 0.02
        self.lm_head_bias = jax.random.normal(k4, (vocab_size,), jnp.float32) * 0.02
        # One-time (load-time) pre-transpose + bf16 cast of the lm_head weight:
        # halves the dominant HBM stream and removes the in-kernel transpose.
        self.lm_head_weight_t = self.lm_head_weight.T.astype(jnp.bfloat16)

    def forward(self, input_ids, positions, kv_caches=None, input_metadata=None):
        # TODO(synk): the real ORT backend runs an opaque exported ONNX causal-LM
        # graph here; a deterministic embedding lookup stands in for it (glue).
        hidden = (jnp.take(self.embed_tokens, input_ids, axis=0)
                  + jnp.take(self.embed_positions, positions, axis=0))
        return hidden

    def sample(self, hidden_states, sampling_metadata=None):
        # Sampler: lm_head projection + greedy token selection in Pallas.
        logits, next_tokens = lm_head_sample(
            hidden_states, self.lm_head_weight_t, self.lm_head_bias)
        return logits, next_tokens


if __name__ == "__main__":
    vocab_size, hidden_size, max_position, num_tokens = 256, 32, 64, 8

    key = jax.random.PRNGKey(0)
    kp, ki = jax.random.split(key)
    model = ORTBackendJAX(vocab_size, hidden_size, max_position, kp)

    input_ids = jax.random.randint(ki, (num_tokens,), 0, vocab_size, jnp.int32)
    positions = jnp.arange(num_tokens, dtype=jnp.int32)

    hidden = model.forward(input_ids, positions, kv_caches=None,
                           input_metadata=None)
    logits, next_tokens = model.sample(hidden)
    jax.block_until_ready((logits, next_tokens))

    # Reference check (plain JAX) with the same bf16 cast of weight/activation.
    hb = hidden.astype(jnp.bfloat16).astype(jnp.float32)
    wb = model.lm_head_weight.astype(jnp.bfloat16).astype(jnp.float32)
    ref_logits = hb @ wb.T + model.lm_head_bias
    assert jnp.allclose(logits, ref_logits, atol=1e-3, rtol=1e-3)
    # Greedy tokens must be the exact argmax of the logits the kernel produced.
    assert jnp.array_equal(next_tokens, jnp.argmax(logits, axis=-1))

    print("KERNEL_OK")
</pallas_src>

<mosaic_0001>
module attributes {stable_mosaic.version = 11 : i64} {
  func.func @_lm_head_sample_kernel(%arg0: i32, %arg1: i32, %arg2: memref<8x32xbf16, #tpu.memory_space<vmem>>, %arg3: memref<32x128xbf16, #tpu.memory_space<vmem>>, %arg4: memref<1x128xf32, #tpu.memory_space<vmem>>, %arg5: memref<8x128xf32, #tpu.memory_space<vmem>>, %arg6: memref<1x8x1xf32, #tpu.memory_space<vmem>>, %arg7: memref<1x8x1xi32, #tpu.memory_space<vmem>>, %arg8: memref<8x1xf32, #tpu.memory_space<vmem>>, %arg9: memref<8x1xi32, #tpu.memory_space<vmem>>) attributes {dimension_semantics = [#tpu.dimension_semantics<parallel>, #tpu.dimension_semantics<arbitrary>], iteration_bounds = array<i64: 2, 1>, scalar_prefetch = 0 : i64, scratch_operands = 2 : i64, tpu.core_type = #tpu.core_type<tc>, window_params = [{pipeline_mode = #tpu.pipeline_mode<synchronous>, transform_indices = @transform_0, window_bounds = array<i64: 8, 32>}, {transform_indices = @transform_1, window_bounds = array<i64: 32, 128>}, {transform_indices = @transform_2, window_bounds = array<i64: 1, 128>}, {transform_indices = @transform_3, window_bounds = array<i64: 8, 128>}, {transform_indices = @transform_4, window_bounds = array<i64: 1, 8, 1>}, {transform_indices = @transform_5, window_bounds = array<i64: 1, 8, 1>}]} {
    %c0_i32 = arith.constant 0 : i32
    %0 = arith.cmpi eq, %arg1, %c0_i32 : i32
    %1 = arith.extui %0 : i1 to i32
    %c0_i32_0 = arith.constant 0 : i32
    %2 = arith.cmpi ne, %1, %c0_i32_0 : i32
    scf.if %2 {
      %cst_23 = arith.constant 0xFF800000 : f32
      %35 = vector.broadcast %cst_23 : f32 to vector<8x1xf32>
      %c0_24 = arith.constant 0 : index
      %c0_25 = arith.constant 0 : index
      %36 = vector.load %arg8[%c0_24, %c0_25] : memref<8x1xf32, #tpu.memory_space<vmem>>, vector<8x1xf32>
      tpu.vector_store %arg8[%c0_24, %c0_25], %35 {strides = array<i32>} : memref<8x1xf32, #tpu.memory_space<vmem>>, vector<8x1xf32>,
      %c0_i32_26 = arith.constant 0 : i32
      %37 = vector.broadcast %c0_i32_26 : i32 to vector<8x1xi32>
      %c0_27 = arith.constant 0 : index
      %c0_28 = arith.constant 0 : index
      %38 = vector.load %arg9[%c0_27, %c0_28] : memref<8x1xi32, #tpu.memory_space<vmem>>, vector<8x1xi32>
      tpu.vector_store %arg9[%c0_27, %c0_28], %37 {strides = array<i32>} : memref<8x1xi32, #tpu.memory_space<vmem>>, vector<8x1xi32>,
    } else {
    }
    %c0 = arith.constant 0 : index
    %c0_1 = arith.constant 0 : index
    %3 = vector.load %arg2[%c0, %c0_1] : memref<8x32xbf16, #tpu.memory_space<vmem>>, vector<8x32xbf16>
    %c0_2 = arith.constant 0 : index
    %c0_3 = arith.constant 0 : index
    %4 = vector.load %arg3[%c0_2, %c0_3] : memref<32x128xbf16, #tpu.memory_space<vmem>>, vector<32x128xbf16>
    %cst = arith.constant dense<0.000000e+00> : vector<8x128xf32>
    %5 = tpu.matmul %3, %4, %cst {dimension_numbers = #tpu.dot_dimension_numbers<[1], [0], [0], [1], [0, 0, 1, 1], [], []>} : vector<8x32xbf16>, vector<32x128xbf16>, vector<8x128xf32> -> vector<8x128xf32>
    %c0_4 = arith.constant 0 : index
    %c0_5 = arith.constant 0 : index
    %6 = vector.load %arg4[%c0_4, %c0_5] : memref<1x128xf32, #tpu.memory_space<vmem>>, vector<1x128xf32>
    %7 = vector.broadcast %6 : vector<1x128xf32> to vector<8x128xf32>
    %8 = arith.addf %5, %7 : vector<8x128xf32>
    %c0_6 = arith.constant 0 : index
    %c0_7 = arith.constant 0 : index
    %9 = vector.load %arg5[%c0_6, %c0_7] : memref<8x128xf32, #tpu.memory_space<vmem>>, vector<8x128xf32>
    tpu.vector_store %arg5[%c0_6, %c0_7], %8 {strides = array<i32>} : memref<8x128xf32, #tpu.memory_space<vmem>>, vector<8x128xf32>,
    %c1_i32 = arith.constant 1 : i32
    %10 = arith.muli %arg0, %c1_i32 : i32
    %11 = arith.addi %10, %arg1 : i32
    %c128_i32 = arith.constant 128 : i32
    %12 = arith.muli %11, %c128_i32 : i32
    %cst_8 = arith.constant dense<0xFF800000> : vector<8xf32>
    %13 = vector.multi_reduction <maximumf>, %8, %cst_8 [1] : vector<8x128xf32> to vector<8xf32>
    %14 = vector.shape_cast %13 : vector<8xf32> to vector<8x1xf32>
    %15 = tpu.iota {dimensions = array<i32: 1>} : vector<8x128xi32>
    %16 = vector.broadcast %14 : vector<8x1xf32> to vector<8x128xf32>
    %17 = arith.cmpf oeq, %8, %16 : vector<8x128xf32>
    %c128_i32_9 = arith.constant 128 : i32
    %18 = vector.broadcast %c128_i32_9 : i32 to vector<8x128xi32>
    %19 = arith.select %17, %15, %18 : vector<8x128xi1>, vector<8x128xi32>
    %cst_10 = arith.constant dense<2147483647> : vector<8xi32>
    %20 = vector.multi_reduction <minsi>, %19, %cst_10 [1] : vector<8x128xi32> to vector<8xi32>
    %21 = vector.shape_cast %20 : vector<8xi32> to vector<8x1xi32>
    %22 = vector.broadcast %12 : i32 to vector<8x1xi32>
    %23 = arith.addi %21, %22 : vector<8x1xi32>
    %c0_11 = arith.constant 0 : index
    %c0_12 = arith.constant 0 : index
    %24 = vector.load %arg8[%c0_11, %c0_12] : memref<8x1xf32, #tpu.memory_space<vmem>>, vector<8x1xf32>
    %25 = arith.cmpf ogt, %14, %24 : vector<8x1xf32>
    %c0_13 = arith.constant 0 : index
    %c0_14 = arith.constant 0 : index
    %26 = vector.load %arg9[%c0_13, %c0_14] : memref<8x1xi32, #tpu.memory_space<vmem>>, vector<8x1xi32>
    %27 = arith.select %25, %23, %26 : vector<8x1xi1>, vector<8x1xi32>
    %c0_15 = arith.constant 0 : index
    %c0_16 = arith.constant 0 : index
    %28 = vector.load %arg9[%c0_15, %c0_16] : memref<8x1xi32, #tpu.memory_space<vmem>>, vector<8x1xi32>
    tpu.vector_store %arg9[%c0_15, %c0_16], %27 {strides = array<i32>} : memref<8x1xi32, #tpu.memory_space<vmem>>, vector<8x1xi32>,
    %c0_17 = arith.constant 0 : index
    %c0_18 = arith.constant 0 : index
    %29 = vector.load %arg8[%c0_17, %c0_18] : memref<8x1xf32, #tpu.memory_space<vmem>>, vector<8x1xf32>
    %30 = arith.maximumf %29, %14 : vector<8x1xf32>
    %c0_19 = arith.constant 0 : index
    %c0_20 = arith.constant 0 : index
    %31 = vector.load %arg8[%c0_19, %c0_20] : memref<8x1xf32, #tpu.memory_space<vmem>>, vector<8x1xf32>
    tpu.vector_store %arg8[%c0_19, %c0_20], %30 {strides = array<i32>} : memref<8x1xf32, #tpu.memory_space<vmem>>, vector<8x1xf32>,
    %c0_i32_21 = arith.constant 0 : i32
    %32 = arith.cmpi eq, %arg1, %c0_i32_21 : i32
    %33 = arith.extui %32 : i1 to i32
    %c0_i32_22 = arith.constant 0 : i32
    %34 = arith.cmpi ne, %33, %c0_i32_22 : i32
    scf.if %34 {
      %c0_23 = arith.constant 0 : index
      %c0_24 = arith.constant 0 : index
      %35 = vector.load %arg8[%c0_23, %c0_24] : memref<8x1xf32, #tpu.memory_space<vmem>>, vector<8x1xf32>
      %c0_25 = arith.constant 0 : index
      %c0_26 = arith.constant 0 : index
      %c0_27 = arith.constant 0 : index
      %36 = vector.load %arg6[%c0_25, %c0_26, %c0_27] : memref<1x8x1xf32, #tpu.memory_space<vmem>>, vector<1x8x1xf32>
      %37 = vector.shape_cast %36 : vector<1x8x1xf32> to vector<8x1xf32>
      %38 = vector.shape_cast %35 : vector<8x1xf32> to vector<1x8x1xf32>
      tpu.vector_store %arg6[%c0_25, %c0_26, %c0_27], %38 {strides = array<i32>} : memref<1x8x1xf32, #tpu.memory_space<vmem>>, vector<1x8x1xf32>,
      %c0_28 = arith.constant 0 : index
      %c0_29 = arith.constant 0 : index
      %39 = vector.load %arg9[%c0_28, %c0_29] : memref<8x1xi32, #tpu.memory_space<vmem>>, vector<8x1xi32>
      %c0_30 = arith.constant 0 : index
      %c0_31 = arith.constant 0 : index
      %c0_32 = arith.constant 0 : index
      %40 = vector.load %arg7[%c0_30, %c0_31, %c0_32] : memref<1x8x1xi32, #tpu.memory_space<vmem>>, vector<1x8x1xi32>
      %41 = vector.shape_cast %40 : vector<1x8x1xi32> to vector<8x1xi32>
      %42 = vector.shape_cast %39 : vector<8x1xi32> to vector<1x8x1xi32>
      tpu.vector_store %arg7[%c0_30, %c0_31, %c0_32], %42 {strides = array<i32>} : memref<1x8x1xi32, #tpu.memory_space<vmem>>, vector<1x8x1xi32>,
    } else {
    }
    return
  }
  func.func @transform_0(%arg0: i32, %arg1: i32) -> (i32, i32) {
    %c0_i32 = arith.constant 0 : i32
    %c0_i32_0 = arith.constant 0 : i32
    %c0_i32_1 = arith.constant 0 : i32
    return %c0_i32, %c0_i32_0 : i32, i32
  }
  func.func @transform_1(%arg0: i32, %arg1: i32) -> (i32, i32) {
    %c1_i32 = arith.constant 1 : i32
    %0 = arith.muli %arg0, %c1_i32 : i32
    %1 = arith.addi %0, %arg1 : i32
    %c0_i32 = arith.constant 0 : i32
    %c0_i32_0 = arith.constant 0 : i32
    return %c0_i32, %1 : i32, i32
  }
  func.func @transform_2(%arg0: i32, %arg1: i32) -> (i32, i32) {
    %c1_i32 = arith.constant 1 : i32
    %0 = arith.muli %arg0, %c1_i32 : i32
    %1 = arith.addi %0, %arg1 : i32
    %c0_i32 = arith.constant 0 : i32
    %c0_i32_0 = arith.constant 0 : i32
    return %c0_i32, %1 : i32, i32
  }
  func.func @transform_3(%arg0: i32, %arg1: i32) -> (i32, i32) {
    %c1_i32 = arith.constant 1 : i32
    %0 = arith.muli %arg0, %c1_i32 : i32
    %1 = arith.addi %0, %arg1 : i32
    %c0_i32 = arith.constant 0 : i32
    %c0_i32_0 = arith.constant 0 : i32
    return %c0_i32, %1 : i32, i32
  }
  func.func @transform_4(%arg0: i32, %arg1: i32) -> (i32, i32, i32) {
    %c0_i32 = arith.constant 0 : i32
    %c0_i32_0 = arith.constant 0 : i32
    %c0_i32_1 = arith.constant 0 : i32
    return %arg0, %c0_i32, %c0_i32_0 : i32, i32, i32
  }
  func.func @transform_5(%arg0: i32, %arg1: i32) -> (i32, i32, i32) {
    %c0_i32 = arith.constant 0 : i32
    %c0_i32_0 = arith.constant 0 : i32
    %c0_i32_1 = arith.constant 0 : i32
    return %arg0, %c0_i32, %c0_i32_0 : i32, i32, i32
  }
}

</mosaic_0001>

<bundles_post_ra>
// kernel: tpu_custom_call.1
= control target key start
LH: loop header
LB: loop body
LE: loop exit
PB: predicated region body
PF: predicated region fallthrough
CT: control target
= control target key end

     0   :  { %s1137_s0 = inlined_call_operand.hbm [shape: bf16[8,32], index: 0, kind: input, shape index: {}]   ;;  %s1138_s1 = inlined_call_operand.hbm [shape: bf16[32,256], index: 1, kind: input, shape index: {}]   ;;  %s1139_s2 = inlined_call_operand.hbm [shape: f32[1,256], index: 2, kind: input, shape index: {}]   ;;  %s1140_s3 = inlined_call_operand.hbm [shape: f32[8,256], index: 3, kind: output, shape index: {0}]   ;;  %s1141_s4 = inlined_call_operand.vmem [shape: f32[2,8,1], index: 4, kind: output, shape index: {1}]   ;;  %s1142_s5 = inlined_call_operand.vmem [shape: s32[2,8,1], index: 5, kind: output, shape index: {2}]  }
   0x1   :  { %1144 = sst [smem:[#allocation14_spill]] %s1137_s0 }
   0x2   :  { %1145 = sst [smem:[#allocation15_spill]] %s1138_s1 }
   0x3   :  { %11 = vsyncpa [#allocation5], 0 }
   0x4   :  { %12 = vsyncpa [#allocation8], 0 }
   0x5   :  { %14 = vsyncpa [#allocation8 + $0x1], 0 }
   0x6   :  { %15 = vsyncpa [#allocation6], 0 }
   0x7   :  { %17 = vsyncpa [#allocation6 + $0x1], 0  ;;  %s937_s18 = smov 0   ;;  %s939_s19 = smov 0  }
   0x8   :  { %s941_s20 = smov 0   ;;  %s943_s21 = smov 0  }
   0x9   :  { %s945_s22 = smov 0   ;;  %s947_s23 = smov 0  }
   0xa LB: > { %s35_s24 = sadd.s32 1, %s895_s22  ;;  %s65_s25 = sadd.s32 1, %s887_s20  ;;  %s899_s23 = sphi %s947_s23, %s23_s23   ;;  %s895_s22 = sphi %s945_s22, %s1159_s22   ;;  %s891_s21 = sphi %s943_s21, %s1158_s21   ;;  %s887_s20 = sphi %s941_s20, %s1157_s20   ;;  %s883_s19 = sphi %s939_s19, %s1156_s19   ;;  %s879_s18 = sphi %s937_s18, %s1155_s18  }
   0xb   : > { %p37_p0 = scmp.ge.s32.totalorder %s35_s24, 2  ;;  %p72_p1 = scmp.ne.s32.totalorder %s887_s20, %s883_s19 }
   0xc   : > { %p73_p2 = scmp.eq.s32.totalorder %s899_s23, 0  ;;  %p614_p3 = scmp.ge.s32.totalorder %s899_s23, 2 }
   0xd   : > { %s1161_s24 = smov (%p37_p0, %s35_s24), 0  ;;  %p665_p5 = scmp.lt.s32.totalorder %s899_s23, 2 }
   0xe   : > { %p978_p4 = por %p73_p2, %p72_p1  ;;  %s62_s27 = ssub.s32 %s895_s22, %s1161_s24 }
   0xf   : > { %s222_s28 = sand.u32 1, %s899_s23   ;;  %p63_p6 = scmp.eq.s32.totalorder %s62_s27, 0 }
  0x10   : > { %s224_s29 = sand.u32 1, %s887_s20   ;;  %s616_s30 = sshll.u32 %s895_s22, 2 }
  0x11   : > { %s989_s6 = scalar_select %p63_p6, %s887_s20, %s65_s25  }
  0x12   : > { %s615_s7 = sshll.u32 %s224_s29, 4  ;;  %s1147_s1 = sld [smem:[#allocation15_spill]] }
  0x13   : > { %s226_s12 = scalar_lea.vmem [#allocation7], %s615_s7  ;;  %p1000_p7 = pnand %p665_p5, %p978_p4 }
  0x14   : > { %s234_s13 = sshll.u32 %s226_s12, 4  ;;  %s1004_s15 = scalar_lea.sflag [#allocation8], %s222_s28  ;;  %s235_s13 = int_to_ptr.vmem [resolvable:$true] %s234_s13 }
  0x15   : > { %s901_s16 = smov 128   ;;  %s902_s17 = smov 64  }
  0x16   : > { %s903_s25 = smov 4   ;;  %s1010_s27 = sadd.s32 4294967295, %s899_s23  }
  0x17   : > { %s611_s26 = sadd.s32 4294967294, %s899_s23   ;;  %p78_p8 = scmp.ne.s32.totalorder %s883_s19, %s879_s18 }
  0x18   : > { %s231_s10 = scalar_lea.hbm %s1147_s1, %s616_s30  ;;  %p79_p9 = scmp.eq.s32.totalorder %s1010_s27, 0 }
  0x19   : > { %s232_s11 = sshll.u32 %s231_s10, 4  ;;  %p132_p10 = scmp.eq.s32.totalorder %s1010_s27, 1  ;;  %s233_s11 = int_to_ptr.hbm [resolvable:$true] %s232_s11 }
  0x1a   : > { %656 = dma.hbm_to_vmem [thread:$0]  (!%p1000_p7), %s233_s11, 256, %s235_s13, %s1004_s15, %s901_s16, %s902_s17, %s903_s25  }
  0x1b   : > { %p138_p11 = scmp.eq.s32.totalorder %s611_s26, 1  ;;  %p1019_p12 = por %p79_p9, %p78_p8 }
  0x1c   : > { %p612_p13 = scmp.ge.s32.totalorder %s899_s23, 1  ;;  %p1027_p0 = por %p132_p10, %p72_p1 }
  0x1d   : > { %p1031_p2 = por %p138_p11, %p78_p8  ;;  %p197_p4 = scmp.lt.s32.totalorder %s899_s23, 3 }
  0x1e   : > { %s1152_s0 = sld [smem:[#allocation14_spill]]  ;;  %s904_s12 = smov [#allocation4]  }
  0x1f   : > { %p1039_p5 = pnand %p612_p13, %p197_p4  ;;  %s211_s13 = sshll.u32 %s904_s12, 4  ;;  %s212_s13 = int_to_ptr.vmem [resolvable:$true] %s211_s13 }
  0x20   : > { %s251_s25 = scalar_lea.hbm %s1139_s2, %s895_s22  ;;  %s247_s26 = scalar_lea.vmem [#allocation9], %s224_s29 }
  0x21   : > { %p649_p1 = pneg %p1039_p5  ;;  %s255_s8 = sshll.u32 %s247_s26, 4  ;;  %s256_s8 = int_to_ptr.vmem [resolvable:$true] %s255_s8 }
  0x22   : > { %s253_s9 = sshll.u32 %s251_s25, 4  ;;  %264 = sbr.rel (%p1039_p5) target bundleno = 552 (0x228), region = 32  ;;  %s254_s9 = int_to_ptr.hbm [resolvable:$true] %s253_s9 }
  0x23   : > { %p650_p6 = pnand %p649_p1, %p79_p9 }
  0x24   : > { %s209_s10 = sshll.u32 %s1152_s0, 4  ;;  %s210_s10 = int_to_ptr.hbm [resolvable:$true] %s209_s10 }
  0x25   : > { %652 = dma.hbm_to_vmem [thread:$0]  (!%p650_p6), %s210_s10, 64, %s212_s13, [#allocation5]  }
  0x26   : > { %659 = dma.hbm_to_vmem [thread:$0]  (!%p1000_p7), %s254_s9, 16, %s256_s8, %s1004_s15  }
  0x27   : > { %866 = dma.done.wait (%p79_p9), [#allocation5], 64  }
  0x28   : > { %868 = vsyncadd (%p79_p9), [#allocation5], 4294967232  ;;  %s271_s29 = sand.u32 1, %s1010_s27   ;;  %s1064_s12 = sand.u32 1, %s883_s19  }
  0x29   : > { %s619_s16 = sshll.u32 %s1064_s12, 4  ;;  %s272_s10 = scalar_lea.sflag [#allocation8], %s271_s29 }
  0x2a   : > { %s275_s14 = scalar_lea.vmem [#allocation7], %s619_s16 }
  0x2b   : > { %870 = dma.done.wait (%p1019_p12), %s272_s10, 272  }
  0x2c   : > { %872 = vsyncadd (%p1019_p12), %s272_s10, 4294967024  ;;  %v638_v0 = vld [vmem:[%s275_s14 + $0x8] sm:$0xff]  ;;  %s284_s15 = scalar_lea.vmem [#allocation9], %s1064_s12  ;;  %v637_v1 = vld [vmem:[%s275_s14] sm:$0xff]  ;;  %vm364_vm0 = vcmask 261120   ;;  %vm340_vm1 = vcmask 7168   ;;  %v386_v8 = vlaneseq }
  0x2d   : > { %374 = vmatpush.bf16.msra.mxu0 %v638_v0  ;;  %v343_v2 = vld [vmem:[#allocation4] sm:$0xf]  ;;  %v905_v3 = vmov -inf   ;;  %s620_s27 = sshll.u32 %s1064_s12, 3  ;;  %p327_p7 = scmp.lt.s32.totalorder %s891_s21, 1  ;;  %v906_v17 = vmov 0  }
  0x2e   : > { %341 = vst.msk [vmem:[#allocation2] sm:$0xff] %vm340_vm1, %v905_v3  ;;  %v722_v4 = vld [vmem:[%s284_s15] ss:$0 sm:$0xff]  ;;  %s1074_s28 = scalar_lea.vmem [#allocation10], %s620_s27  ;;  %v387_v10 = vand.u32 127, %v386_v8  ;;  %s634_s8 = sshll.u32 %s891_s21, 3 }
  0x2f   : > { %s1079_s11 = scalar_select %p327_p7, %s891_s21, 1  ;;  %342 = vst.msk [vmem:[#allocation3] sm:$0xff] %vm340_vm1, %v906_v17 }
  0x30   : > { %s442_s16 = scalar_lea.hbm %s1140_s3, %s634_s8  ;;  %s444_s10 = sshll.u32 %s1074_s28, 4  ;;  %s445_s10 = int_to_ptr.vmem [resolvable:$true] %s444_s10 }
  0x31   : > { %375 = vmatpush.bf16.msra.mxu0 %v637_v1  ;;  %s1143_s13 = sshll.u32 %s1079_s11, 3  ;;  %s446_s14 = sshll.u32 %s442_s16, 4  ;;  %s447_s14 = int_to_ptr.hbm [resolvable:$true] %s446_s14 }
  0x32   : > { %s330_s26 = scalar_lea.vmem %s1141_s4, %s1143_s13  ;;  %s423_s15 = scalar_lea.sflag [#allocation6], %s1064_s12 }
  0x33   : > { %s827_s27 = sshra.s32 %s447_s14, 4  ;;  %s833_s13 = scalar_lea.hbm %s1140_s3, 16  ;;  %s828_s27 = int_to_ptr.hbm [resolvable:$true] %s827_s27 }
  0x34   : > { %631 = vmatmul.msk.bf16.vlgmr.msra.gmra.mxu0 %vm364_vm0, %v343_v2  ;;  %s829_s17 = scalar_lea.hbm %s828_s27, 8  ;;  %p834_p11 = scmp.lt.s32.totalorder %s828_s27, %s1140_s3 }
  0x35   : > { %v406_v9 = vld [vmem:[#allocation2] sm:$0xff]  ;;  %p830_p8 = scmp.ne.s32.totalorder %s828_s27, %s829_s17  ;;  %p835_p12 = scmp.lt.s32.totalorder %s833_s13, %s829_s17 }
  0x37   : > { %p831_p9 = pnand %p830_p8, %p1027_p0  ;;  %p836_p13 = por %p835_p12, %p834_p11 }
  0x39   : > { %p832_p10 = pneg %p831_p9 }
  0x3b   : > { %p837_p4 = pnand %p836_p13, %p832_p10 }
  0xb1   : > { %v377_v5 = vpop.f32.mrf.mxu0 }
  0xb2   : > { %v378_v6 = vadd.f32 %v722_v4, %v377_v5 }
  0xb4   : > { %381 = vst [vmem:[%s1074_s28] sm:$0xff] %v378_v6  ;;  %384 = vmax.xlane.f32.xlu0 %v378_v6 }
  0xb9   : > { %v379_v7 = vpop.f32.mrf.mxu0 }
 0x127   : > { %v385_v11 = vpop.xlane.xlu0 %384 }
 0x128   : > { %vm388_vm2 = vcmp.eq.f32.partialorder %v378_v6, %v385_v11  ;;  %v413_v12 = vmax.f32 %v406_v9, %v385_v11 }
 0x129   : > { %v389_v13 = vsel %vm388_vm2, %v387_v10, 128 }
 0x12a   : > { %414 = vst.msk [vmem:[#allocation2] sm:$0xff] %vm340_vm1, %v413_v12  ;;  %v391_v14 = vshra.s32 %v389_v13, 16  ;;  %v390_v18 = vand.u32 65535, %v389_v13 }
 0x12c   : > { %v393_v15 = vcvt.s32.f32 %v391_v14  ;;  %v392_v20 = vcvt.s32.f32 %v390_v18 }
 0x12e   : > { %394 = vmin.xlane.f32.xlu0 %v393_v15 }
 0x131   : > { %v418_v16 = vld [vmem:[#allocation2] sm:$0xff] }
 0x132   : > { %419 = vst.msk [vmem:[%s330_s26] sm:$0xff] %vm340_vm1, %v418_v16 }
 0x1a1   : > { %v395_v19 = vpop.xlane.xlu0 %394 }
 0x1a2   : > { %vm396_vm3 = vcmp.eq.f32.partialorder %v393_v15, %v395_v19 }
 0x1a3   : > { %v397_v21 = vsel %vm396_vm3, %v392_v20, inf }
 0x1a4   : > { %398 = vmin.xlane.f32.xlu1 %v397_v21 }
 0x1a5   : > { %840 = shalt.err (!%p837_p4)
}
 0x1a6   : > { %647 = dma.vmem_to_hbm [thread:$0]  (%p1027_p0), %s445_s10, 128, %s447_s14, %s423_s15   ;;  %v401_v22 = vcvt.f32.s32 %v395_v19  ;;  %v408_v28 = vld [vmem:[#allocation3] sm:$0xff]  ;;  %vm407_vm4 = vcmp.gt.f32.partialorder %v385_v11, %v406_v9 }
 0x1a7   : > { %s632_s12 = sshll.u32 %s891_s21, 7  ;;  %s1154_s0 = sshll.u32 %s1079_s11, 3 }
 0x1a8   : > { %v402_v24 = vshll.u32 %v401_v22, 16  ;;  %v404_v26 = vstv %s632_s12  ;;  %s334_s30 = scalar_lea.vmem %s1142_s5, %s1154_s0 }
 0x217   : > { %v399_v23 = vpop.xlane.xlu1 %398 }
 0x218   : > { %v400_v25 = vcvt.f32.s32 %v399_v23 }
 0x21a   : > { %v403_v27 = vadd.s32 %v402_v24, %v400_v25 }
 0x21c   : > { %v405_v29 = vadd.s32 %v404_v26, %v403_v27 }
 0x21e   : > { %v409_v30 = vsel %vm407_vm4, %v405_v29, %v408_v28 }
 0x21f   : > { %411 = vst.msk [vmem:[#allocation3] sm:$0xff] %vm340_vm1, %v409_v30 }
 0x226   : > { %v420_v31 = vld [vmem:[#allocation3] sm:$0xff] }
 0x227   : > { %421 = vst.msk [vmem:[%s334_s30] sm:$0xff] %vm340_vm1, %v420_v31 }
 0x228 PF: > { %s464_s21 = sand.u32 1, %s879_s18   ;;  %p661_p0 = pnand %p614_p3, %p1031_p2 }
 0x229   : > { %s465_s13 = scalar_lea.sflag [#allocation6], %s464_s21 }
 0x22a   : > { %p662_p5 = pneg %p661_p0 }
 0x22c   : > { %874 = dma.done.wait (%p662_p5), %s465_s13, 128  }
 0x22d   : > { %876 = vsyncadd (%p662_p5), %s465_s13, 4294967168  ;;  %s23_s23 = sadd.s32 1, %s899_s23   ;;  %s1155_s18 = smov %s883_s19 }
 0x22e   : > { %p20_p1 = scmp.ge.s32.totalorder %s23_s23, 4   ;;  %s1156_s19 = smov %s887_s20 }
 0x22f   : > { %s1157_s20 = smov %s989_s6  ;;  %s1158_s21 = smov %s895_s22 }
 0x230   : > { %s1159_s22 = smov %s1161_s24  ;;  %22 = sbr.rel (!%p20_p1) target bundleno = 10 (0xa), region = 125 }
 0x235   :  { %485 = vsyncpa [#allocation5], 1 }
 0x236   :  { %487 = vsyncpa [#allocation5 + $0x1], 1 }
 0x237   :  { %488 = vsyncpa [#allocation8], 1 }
 0x238   :  { %490 = vsyncpa [#allocation8 + $0x1], 1 }
 0x239   :  { %491 = vsyncpa [#allocation6], 1 }
 0x23a   :  { %493 = vsyncpa [#allocation6 + $0x1], 1 }

</bundles_post_ra>
